<compile_context>
chip_gen: v6e
topology: v6e:2x2x1
jax: 0.10.0
libtpu: 0.0.40
codegen_flags: <defaults>
</compile_context>

<pallas_src>
import functools

import jax
import jax.numpy as jnp
from jax.experimental import pallas as pl
from jax.experimental.pallas import tpu as pltpu


def _round_up(x, m):
    return ((x + m - 1) // m) * m


def _linear_kernel(x_ref, w_ref, b_ref, o_ref, *, compute_dtype):
    # x_ref: [TM, K]   activation tile (input dtype)
    # w_ref: [K,  Np]  weight, pre-transposed + N-padded, already compute_dtype
    # b_ref: [1,  Np]  bias (f32)
    # o_ref: [TM, Np]
    x = x_ref[...].astype(compute_dtype)  # per-tile cast feeds the MXU bf16
    acc = jnp.dot(x, w_ref[...], preferred_element_type=jnp.float32)
    o_ref[...] = (acc + b_ref[...]).astype(o_ref.dtype)


def linear_embedding_sp(x, weight, bias, *, tm=1024, compute_dtype=jnp.bfloat16):
    """y = x @ weight.T + bias  (PyTorch nn.Linear forward).

    x:      [B, S, inp_size]
    weight: [d_model, inp_size]   (PyTorch layout)
    bias:   [d_model]
    Pass compute_dtype=jnp.float32 for exact f32 matmul semantics.
    """
    B, S, K = x.shape
    N = weight.shape[0]
    M = B * S

    # --- weight / bias prep (static parameters; one-time, tiny tensors) ------
    Np = _round_up(N, 128)                         # lane-dense output width
    w_t = weight.T.astype(compute_dtype)           # [K, N]
    if Np != N:
        w_t = jnp.pad(w_t, ((0, 0), (0, Np - N)))
    b2d = (bias if Np == N else jnp.pad(bias, (0, Np - N)))
    b2d = b2d.astype(jnp.float32).reshape(1, Np)

    # --- activations: no padding / no extra HBM pass --------------------------
    x2d = x.reshape(M, K)

    x_itemsize = jnp.dtype(x.dtype).itemsize
    w_itemsize = jnp.dtype(compute_dtype).itemsize
    out_dtype = x.dtype
    out_itemsize = jnp.dtype(out_dtype).itemsize

    # --- tile size: biggest M tile that fits the per-step VMEM budget ---------
    TM = min(tm, _round_up(M, 8))                  # multiple of 8 (sublane)

    def footprint(tm_):
        return (2 * tm_ * K * x_itemsize           # x tile, double-buffered
                + 2 * K * Np * w_itemsize          # resident weight (2 bufs allocated)
                + 2 * Np * 4                       # bias
                + 2 * tm_ * Np * out_itemsize)     # out tile, double-buffered

    VMEM_BUDGET = 28 * 1024 * 1024
    while footprint(TM) > VMEM_BUDGET and TM > 8:
        TM = max(8, _round_up(TM // 2, 8))

    grid = (pl.cdiv(M, TM),)                       # 1-D grid over M only

    cost = pl.CostEstimate(
        flops=2 * M * K * Np,
        transcendentals=0,
        bytes_accessed=int(M * K * x_itemsize      # x read once
                           + K * Np * w_itemsize   # weight read once (resident)
                           + Np * 4                # bias
                           + M * Np * out_itemsize),
    )

    # Footprint-derived limit, capped below v7x's 64 MiB physical VMEM.
    vmem_limit = int(min(48 * 1024 * 1024,
                         max(footprint(TM) + 12 * 1024 * 1024, 16 * 1024 * 1024)))

    out2d = pl.pallas_call(
        functools.partial(_linear_kernel, compute_dtype=compute_dtype),
        out_shape=jax.ShapeDtypeStruct((M, Np), out_dtype),
        grid=grid,
        in_specs=[
            pl.BlockSpec((TM, K), lambda i: (i, 0)),    # x: tile M, full K
            pl.BlockSpec((K, Np), lambda i: (0, 0)),    # weight: constant index -> DMA'd once
            pl.BlockSpec((1, Np), lambda i: (0, 0)),    # bias: constant index -> DMA'd once
        ],
        out_specs=pl.BlockSpec((TM, Np), lambda i: (i, 0)),
        compiler_params=pltpu.CompilerParams(
            dimension_semantics=("parallel",),
            vmem_limit_bytes=vmem_limit,
        ),
        cost_estimate=cost,
    )(x2d, w_t, b2d)

    if Np != N:
        out2d = out2d[:, :N]
    return out2d.reshape(B, S, N)


if __name__ == "__main__":
    # Small shapes consistent with the module's forward: x -> Linear(inp_size, d_model)
    B, S, inp_size, d_model = 2, 8, 16, 32

    key = jax.random.PRNGKey(0)
    kx, kw, kb = jax.random.split(key, 3)

    x = jax.random.normal(kx, (B, S, inp_size), dtype=jnp.float32)

    # Deterministic PyTorch-style Linear init: U(-1/sqrt(inp_size), 1/sqrt(inp_size))
    bound = 1.0 / (inp_size ** 0.5)
    weight = jax.random.uniform(kw, (d_model, inp_size), jnp.float32, -bound, bound)
    bias = jax.random.uniform(kb, (d_model,), jnp.float32, -bound, bound)

    out = linear_embedding_sp(x, weight, bias)
    jax.block_until_ready(out)
    assert out.shape == (B, S, d_model)

    # Reference with matching precision (bf16 operands, f32 accumulation, f32 bias).
    xb = x.reshape(B * S, inp_size).astype(jnp.bfloat16)
    wb = weight.astype(jnp.bfloat16)
    ref = (jnp.dot(xb, wb.T, preferred_element_type=jnp.float32)
           + bias).reshape(B, S, d_model)
    assert jnp.allclose(out, ref, atol=1e-3, rtol=1e-3)

    # Sanity vs full-f32 nn.Linear reference (bf16-matmul-level tolerance).
    ref_f32 = x @ weight.T + bias
    assert jnp.allclose(out, ref_f32, atol=1e-1, rtol=1e-1)

    print("KERNEL_OK")
</pallas_src>

<mosaic_0001>
module attributes {stable_mosaic.version = 11 : i64} {
  func.func @_linear_kernel(%arg0: i32, %arg1: memref<16x16xf32, #tpu.memory_space<vmem>>, %arg2: memref<16x128xbf16, #tpu.memory_space<vmem>>, %arg3: memref<1x128xf32, #tpu.memory_space<vmem>>, %arg4: memref<16x128xf32, #tpu.memory_space<vmem>>) attributes {dimension_semantics = [#tpu.dimension_semantics<parallel>], iteration_bounds = array<i64: 1>, scalar_prefetch = 0 : i64, scratch_operands = 0 : i64, tpu.core_type = #tpu.core_type<tc>, window_params = [{transform_indices = @transform_0, window_bounds = array<i64: 16, 16>}, {pipeline_mode = #tpu.pipeline_mode<synchronous>, transform_indices = @transform_1, window_bounds = array<i64: 16, 128>}, {pipeline_mode = #tpu.pipeline_mode<synchronous>, transform_indices = @transform_2, window_bounds = array<i64: 1, 128>}, {transform_indices = @transform_3, window_bounds = array<i64: 16, 128>}]} {
    %c0 = arith.constant 0 : index
    %c0_0 = arith.constant 0 : index
    %0 = vector.load %arg1[%c0, %c0_0] : memref<16x16xf32, #tpu.memory_space<vmem>>, vector<16x16xf32>
    %1 = arith.truncf %0 : vector<16x16xf32> to vector<16x16xbf16>
    %c0_1 = arith.constant 0 : index
    %c0_2 = arith.constant 0 : index
    %2 = vector.load %arg2[%c0_1, %c0_2] : memref<16x128xbf16, #tpu.memory_space<vmem>>, vector<16x128xbf16>
    %cst = arith.constant dense<0.000000e+00> : vector<16x128xf32>
    %3 = tpu.matmul %1, %2, %cst {dimension_numbers = #tpu.dot_dimension_numbers<[1], [0], [0], [1], [0, 0, 1, 1], [], []>} : vector<16x16xbf16>, vector<16x128xbf16>, vector<16x128xf32> -> vector<16x128xf32>
    %c0_3 = arith.constant 0 : index
    %c0_4 = arith.constant 0 : index
    %4 = vector.load %arg3[%c0_3, %c0_4] : memref<1x128xf32, #tpu.memory_space<vmem>>, vector<1x128xf32>
    %5 = vector.broadcast %4 : vector<1x128xf32> to vector<16x128xf32>
    %6 = arith.addf %3, %5 : vector<16x128xf32>
    %c0_5 = arith.constant 0 : index
    %c0_6 = arith.constant 0 : index
    %7 = vector.load %arg4[%c0_5, %c0_6] : memref<16x128xf32, #tpu.memory_space<vmem>>, vector<16x128xf32>
    tpu.vector_store %arg4[%c0_5, %c0_6], %6 {strides = array<i32>} : memref<16x128xf32, #tpu.memory_space<vmem>>, vector<16x128xf32>,
    return
  }
  func.func @transform_0(%arg0: i32) -> (i32, i32) {
    %c0_i32 = arith.constant 0 : i32
    %c0_i32_0 = arith.constant 0 : i32
    return %arg0, %c0_i32 : i32, i32
  }
  func.func @transform_1(%arg0: i32) -> (i32, i32) {
    %c0_i32 = arith.constant 0 : i32
    %c0_i32_0 = arith.constant 0 : i32
    %c0_i32_1 = arith.constant 0 : i32
    return %c0_i32, %c0_i32_0 : i32, i32
  }
  func.func @transform_2(%arg0: i32) -> (i32, i32) {
    %c0_i32 = arith.constant 0 : i32
    %c0_i32_0 = arith.constant 0 : i32
    %c0_i32_1 = arith.constant 0 : i32
    return %c0_i32, %c0_i32_0 : i32, i32
  }
  func.func @transform_3(%arg0: i32) -> (i32, i32) {
    %c0_i32 = arith.constant 0 : i32
    %c0_i32_0 = arith.constant 0 : i32
    return %arg0, %c0_i32 : i32, i32
  }
}

</mosaic_0001>

<bundles_post_ra>
// kernel: tpu_custom_call.1
= control target key start
LH: loop header
LB: loop body
LE: loop exit
PB: predicated region body
PF: predicated region fallthrough
CT: control target
= control target key end

     0   :  { %8 = vsyncpa [#allocation3], 0  ;;  %s261_s0 = inlined_call_operand.hbm [shape: f32[16,16], index: 0, kind: input, shape index: {}]   ;;  %s262_s1 = inlined_call_operand.hbm [shape: bf16[16,128], index: 1, kind: input, shape index: {}]   ;;  %s263_s2 = inlined_call_operand.vmem [shape: f32[1,128], index: 2, kind: input, shape index: {}]   ;;  %s264_s3 = inlined_call_operand.hbm [shape: f32[16,128], index: 3, kind: output, shape index: {}]  }
   0x1   :  { %9 = vsyncpa [#allocation6], 0 }
   0x2   :  { %10 = vsyncpa [#allocation4], 0  ;;  %s214_s12 = smov [#allocation2]  }
   0x3   :  { %s16_s13 = sshll.u32 %s214_s12, 4  ;;  %s17_s13 = int_to_ptr.vmem [resolvable:$true] %s16_s13 }
   0x4   :  { %s156_s14 = scalar_lea.vmem %s17_s13, 256  ;;  %p161_p1 = scmp.lt.s32.totalorder %s17_s13, %s17_s13 }
   0x5   :  { %p157_p0 = scmp.ne.s32.totalorder %s17_s13, %s156_s14  ;;  %p162_p2 = scmp.lt.s32.totalorder %s156_s14, %s156_s14 }
   0x7   :  { %p163_p3 = por %p162_p2, %p161_p1 }
   0x9   :  { %p164_p4 = pnand %p163_p3, %p157_p0 }
   0xb   :  { %167 = shalt.err (!%p164_p4)
}
   0xc   :  { %s215_s15 = smov 128   ;;  %s216_s16 = smov 8  }
   0xd   :  { %22 = dma.hbm_to_vmem [thread:$0]  %s261_s0, 256, %s17_s13, [#allocation3], %s215_s15, %s215_s15, %s216_s16  }
   0xe   :  { %s217_s19 = smov [#allocation5]  }
   0xf   :  { %s28_s20 = sshll.u32 %s217_s19, 4  ;;  %s29_s20 = int_to_ptr.vmem [resolvable:$true] %s28_s20 }
  0x10   :  { %s176_s21 = scalar_lea.vmem %s29_s20, 128  ;;  %p181_p6 = scmp.lt.s32.totalorder %s29_s20, %s29_s20 }
  0x11   :  { %p177_p5 = scmp.ne.s32.totalorder %s29_s20, %s176_s21  ;;  %p182_p7 = scmp.lt.s32.totalorder %s176_s21, %s176_s21 }
  0x13   :  { %p183_p8 = por %p182_p7, %p181_p6 }
  0x15   :  { %p184_p9 = pnand %p183_p8, %p177_p5 }
  0x17   :  { %187 = shalt.err (!%p184_p9)
}
  0x18   :  { %s218_s22 = smov 64   ;;  %s219_s23 = smov 4  }
  0x19   :  { %34 = dma.hbm_to_vmem [thread:$0]  %s262_s1, 128, %s29_s20, [#allocation6], %s218_s22, %s218_s22, %s219_s23  }
  0x1a   :  { %208 = dma.done.wait [#allocation3], 256  }
  0x1b   :  { %209 = vsyncadd [#allocation3], 4294967040 }
  0x1c   :  { %210 = dma.done.wait [#allocation6], 128  }
  0x1d   :  { %211 = vsyncadd [#allocation6], 4294967168  ;;  %v220_v0 = vmov 0.0   ;;  %vm221_vm0 = vmmov 0   ;;  %v147_v1 = vld [vmem:[#allocation5] sm:$0xff]   ;;  %v44_v2 = vld [vmem:[#allocation2] sm:$0xff] }
  0x1e   :  { %132 = vmatprep.subr.bf16.mxu0 %v220_v0  ;;  %134 = vmatprep.mubr.msk.bf16.mxu0 %vm221_vm0, %v220_v0  ;;  %v45_v3 = vld [vmem:[#allocation2 + $0x8] sm:$0xff]  ;;  %vm62_vm1 = vcmask 130048   ;;  %v127_v5 = vld [vmem:[%s263_s2] ss:$0 sm:$0xff]  ;;  %s222_s1 = smov [#allocation7]  }
  0x1f   :  { %133 = vmatpush3.bf16.msra.mxu0 %v147_v1  ;;  %v46_v4 = vpack.c.bf16 %v45_v3, %v44_v2  ;;  %s114_s27 = sshll.u32 %s222_s1, 4  ;;  %s115_s27 = int_to_ptr.vmem [resolvable:$true] %s114_s27 }
  0x20   :  { %s188_s28 = scalar_lea.vmem %s115_s27, 256  ;;  %p193_p11 = scmp.lt.s32.totalorder %s115_s27, %s115_s27 }
  0x21   :  { %p189_p10 = scmp.ne.s32.totalorder %s115_s27, %s188_s28  ;;  %p194_p12 = scmp.lt.s32.totalorder %s188_s28, %s188_s28 }
  0x22   :  { %135 = vmatmul.mubr.msk.bf16.vlgmr.msra.gmra.mxu0 %vm62_vm1, %v46_v4 }
  0x23   :  { %p195_p13 = por %p194_p12, %p193_p11 }
  0x25   :  { %p196_p0 = pnand %p195_p13, %p189_p10 }
  0xe2   :  { %v100_v6 = vpop.f32.mrf.mxu0 }
  0xe3   :  { %v101_v7 = vadd.f32 %v127_v5, %v100_v6 }
  0xe4   :  { %v136_v8 = vpop.f32.mrf.mxu0 }
  0xe5   :  { %107 = vst [vmem:[#allocation7] sm:$0xff] %v101_v7 }
  0xe6   :  { %v103_v9 = vpop.f32.mrf.mxu0 }
  0xe7   :  { %v104_v10 = vadd.f32 %v127_v5, %v103_v9 }
  0xe8   :  { %v137_v11 = vpop.f32.mrf.mxu0 }
  0xe9   :  { %108 = vst [vmem:[#allocation7 + $0x8] sm:$0xff] %v104_v10 }
  0xea   :  { %199 = shalt.err (!%p196_p0)
}
  0xeb   :  { %120 = dma.vmem_to_hbm [thread:$0]  %s115_s27, 256, %s264_s3, [#allocation4], %s215_s15, %s215_s15, %s216_s16  }
  0xec   :  { %212 = dma.done.wait [#allocation4], 256  }
  0xed   :  { %213 = vsyncadd [#allocation4], 4294967040 }
  0xee   :  { %124 = vsyncpa [#allocation3], 1 }
  0xef   :  { %125 = vsyncpa [#allocation6], 1 }
  0xf0   :  { %126 = vsyncpa [#allocation4], 1 }

</bundles_post_ra>
